<compile_context>
chip_gen: v6e
topology: v6e:2x2x1
jax: 0.10.0
libtpu: 0.0.40
codegen_flags: <defaults>
</compile_context>

<pallas_src>
import jax
import jax.numpy as jnp
from jax.experimental import pallas as pl
from jax.experimental.pallas import tpu as pltpu


def _linear_t_kernel(xt_ref, w_ref, b_ref, ot_ref):
    # xt_ref: (C_in, TN)   w_ref: (C_out, C_in)   b_ref: (C_out, 1)
    # ot_ref: (C_out, TN)
    xt = xt_ref[...]                               # (C_in, TN) f32
    w = w_ref[...]                                 # (C_out, C_in) f32
    b = b_ref[...]                                 # (C_out, 1) f32
    c_in = w_ref.shape[1]

    # Unrolled VPU FMAs over the tiny contraction dim (C_in == 3): no MXU.
    # Bias is folded into the first FMA via broadcasting (no extra full-width
    # broadcast_to pass over the accumulator).
    acc = w[:, 0:1] * xt[0:1, :] + b               # (C_out, TN) f32
    for k in range(1, c_in):                       # static, fully unrolled
        acc = acc + w[:, k:k + 1] * xt[k:k + 1, :]

    ot_ref[...] = acc.astype(ot_ref.dtype)


def _default_tile_n():
    """Per-generation N tile: big enough to amortize the ~0.35us grid-step
    overhead, small enough to stay within each generation's scoped-VMEM
    default with double-buffered input + output streams."""
    try:
        kind = jax.devices()[0].device_kind.lower()
    except Exception:  # pragma: no cover - defensive; fall back to safe tile
        return 65536
    if ("v7" in kind) or ("v6" in kind):
        # ~16 MiB double-buffered (in+out), under the 32 MiB scoped default.
        return 131072
    # v5e / unknown: ~8 MiB double-buffered, under the 16 MiB scoped default.
    return 65536


def linear_forward_t(x_t, weight, bias, *, tile_n=None, core_parallel=False):
    """Lane-dense path: x_t (C_in, N), weight (C_out, C_in), bias (C_out,) -> (C_out, N).

    This is the preferred, transpose-free entry point: keep data channel-major
    end to end and the kernel moves only the minimal 36 B/sample of HBM traffic.
    """
    if tile_n is None:
        tile_n = _default_tile_n()
    c_in, n = x_t.shape
    c_out = weight.shape[0]
    b2d = bias.reshape(c_out, 1)

    # Tile the (lane) N axis.  For small N use a single full-extent block
    # (allowed even when N is not a multiple of 128); otherwise use the big
    # tile and let Pallas clip the partial last block.
    tn = n if n <= tile_n else tile_n
    grid = (pl.cdiv(n, tn),)

    # On v7x, core_parallel=True shards the N grid axis across both
    # TensorCores (each with its own path to HBM).  Default stays "parallel"
    # which is safe on every generation.
    dim_sem = (pltpu.CORE_PARALLEL,) if core_parallel else ("parallel",)

    return pl.pallas_call(
        _linear_t_kernel,
        out_shape=jax.ShapeDtypeStruct((c_out, n), x_t.dtype),
        grid=grid,
        in_specs=[
            pl.BlockSpec((c_in, tn), lambda i: (0, i)),      # streamed along N
            pl.BlockSpec((c_out, c_in), lambda i: (0, 0)),   # resident weight
            pl.BlockSpec((c_out, 1), lambda i: (0, 0)),      # resident bias
        ],
        out_specs=pl.BlockSpec((c_out, tn), lambda i: (0, i)),
        compiler_params=pltpu.CompilerParams(
            dimension_semantics=dim_sem,
        ),
    )(x_t, weight, b2d)


# Below this many rows, a fused XLA dot beats pallas_call launch + boundary
# transposes + a 1-step grid, so skip Pallas entirely.
_SMALL_N_THRESHOLD = 4096


def linear_forward(x, weight, bias, *, tile_n=None, core_parallel=False,
                   small_n_threshold=_SMALL_N_THRESHOLD):
    """PyTorch-style interface: x (N, C_in) -> (N, C_out).

    For small N this is a plain fused XLA affine map (strictly faster than a
    kernel launch + two transposes).  For large N it transposes to the
    lane-dense (C, N) layout and runs the Pallas kernel; callers that already
    hold channel-major data should call `linear_forward_t` directly and avoid
    the boundary transposes altogether.
    """
    n = x.shape[0]
    if n < small_n_threshold:
        return x @ weight.T + bias
    y_t = linear_forward_t(x.T, weight, bias, tile_n=tile_n,
                           core_parallel=core_parallel)
    return y_t.T


class PallasModel:
    """Mirror of the PyTorch Model: holds fc = Linear(input_channel, 6)."""

    def __init__(self, input_channel=3, num_class=4, key=jax.random.PRNGKey(42)):
        kw, kb = jax.random.split(key)
        bound = 1.0 / jnp.sqrt(input_channel)
        # PyTorch-Linear-style uniform(-1/sqrt(fan_in), 1/sqrt(fan_in)) init.
        self.weight = jax.random.uniform(
            kw, (6, input_channel), dtype=jnp.float32, minval=-bound, maxval=bound
        )
        self.bias = jax.random.uniform(
            kb, (6,), dtype=jnp.float32, minval=-bound, maxval=bound
        )

    def forward(self, x):
        # Reference forward() is `pass`; we run the declared fc layer instead.
        return linear_forward(x, self.weight, self.bias)

    def forward_t(self, x_t):
        # Transpose-free channel-major path (preferred for large batches).
        return linear_forward_t(x_t, self.weight, self.bias)


if __name__ == "__main__":
    key = jax.random.PRNGKey(0)
    k1, k2, k3 = jax.random.split(key, 3)

    input_channel = 3
    model = PallasModel(input_channel=input_channel, num_class=4)

    # 1) Small batch through the PyTorch-style interface (small-N fast path).
    batch = 8
    x = jax.random.normal(k1, (batch, input_channel), dtype=jnp.float32)
    out = jax.block_until_ready(model.forward(x))
    ref = x @ model.weight.T + model.bias
    assert out.shape == (batch, 6)
    assert jnp.allclose(out, ref, atol=1e-5, rtol=1e-5)

    # 2) Channel-major Pallas kernel, multi-step grid (transpose-free path).
    n_large = 512
    x_t = jax.random.normal(k2, (input_channel, n_large), dtype=jnp.float32)
    out_t = jax.block_until_ready(
        linear_forward_t(x_t, model.weight, model.bias, tile_n=128)
    )
    ref_t = model.weight @ x_t + model.bias.reshape(6, 1)
    assert out_t.shape == (6, n_large)
    assert jnp.allclose(out_t, ref_t, atol=1e-5, rtol=1e-5)

    # 3) PyTorch-style interface forced through Pallas, partial last block.
    batch2 = 300
    x2 = jax.random.normal(k3, (batch2, input_channel), dtype=jnp.float32)
    out2 = jax.block_until_ready(
        linear_forward(x2, model.weight, model.bias, tile_n=128,
                       small_n_threshold=0)
    )
    ref2 = x2 @ model.weight.T + model.bias
    assert out2.shape == (batch2, 6)
    assert jnp.allclose(out2, ref2, atol=1e-5, rtol=1e-5)

    print("KERNEL_OK")
</pallas_src>

<mosaic_0001>
module attributes {stable_mosaic.version = 11 : i64} {
  func.func @_linear_t_kernel(%arg0: i32, %arg1: memref<3x128xf32, #tpu.memory_space<vmem>>, %arg2: memref<6x3xf32, #tpu.memory_space<vmem>>, %arg3: memref<6x1xf32, #tpu.memory_space<vmem>>, %arg4: memref<6x128xf32, #tpu.memory_space<vmem>>) attributes {dimension_semantics = [#tpu.dimension_semantics<parallel>], iteration_bounds = array<i64: 4>, scalar_prefetch = 0 : i64, scratch_operands = 0 : i64, tpu.core_type = #tpu.core_type<tc>, window_params = [{transform_indices = @transform_0, window_bounds = array<i64: 3, 128>}, {pipeline_mode = #tpu.pipeline_mode<synchronous>, transform_indices = @transform_1, window_bounds = array<i64: 6, 3>}, {pipeline_mode = #tpu.pipeline_mode<synchronous>, transform_indices = @transform_2, window_bounds = array<i64: 6, 1>}, {transform_indices = @transform_3, window_bounds = array<i64: 6, 128>}]} {
    %c0 = arith.constant 0 : index
    %c0_0 = arith.constant 0 : index
    %0 = vector.load %arg1[%c0, %c0_0] : memref<3x128xf32, #tpu.memory_space<vmem>>, vector<3x128xf32>
    %c0_1 = arith.constant 0 : index
    %c0_2 = arith.constant 0 : index
    %1 = vector.load %arg2[%c0_1, %c0_2] : memref<6x3xf32, #tpu.memory_space<vmem>>, vector<6x3xf32>
    %c0_3 = arith.constant 0 : index
    %c0_4 = arith.constant 0 : index
    %2 = vector.load %arg3[%c0_3, %c0_4] : memref<6x1xf32, #tpu.memory_space<vmem>>, vector<6x1xf32>
    %3 = vector.extract_strided_slice %1 {offsets = [0, 0], sizes = [6, 1], strides = [1, 1]} : vector<6x3xf32> to vector<6x1xf32>
    %4 = vector.extract_strided_slice %0 {offsets = [0, 0], sizes = [1, 128], strides = [1, 1]} : vector<3x128xf32> to vector<1x128xf32>
    %5 = vector.broadcast %3 : vector<6x1xf32> to vector<6x128xf32>
    %6 = vector.broadcast %4 : vector<1x128xf32> to vector<6x128xf32>
    %7 = arith.mulf %5, %6 : vector<6x128xf32>
    %8 = vector.broadcast %2 : vector<6x1xf32> to vector<6x128xf32>
    %9 = arith.addf %7, %8 : vector<6x128xf32>
    %10 = vector.extract_strided_slice %1 {offsets = [0, 1], sizes = [6, 1], strides = [1, 1]} : vector<6x3xf32> to vector<6x1xf32>
    %11 = vector.extract_strided_slice %0 {offsets = [1, 0], sizes = [1, 128], strides = [1, 1]} : vector<3x128xf32> to vector<1x128xf32>
    %12 = vector.broadcast %10 : vector<6x1xf32> to vector<6x128xf32>
    %13 = vector.broadcast %11 : vector<1x128xf32> to vector<6x128xf32>
    %14 = arith.mulf %12, %13 : vector<6x128xf32>
    %15 = arith.addf %9, %14 : vector<6x128xf32>
    %16 = vector.extract_strided_slice %1 {offsets = [0, 2], sizes = [6, 1], strides = [1, 1]} : vector<6x3xf32> to vector<6x1xf32>
    %17 = vector.extract_strided_slice %0 {offsets = [2, 0], sizes = [1, 128], strides = [1, 1]} : vector<3x128xf32> to vector<1x128xf32>
    %18 = vector.broadcast %16 : vector<6x1xf32> to vector<6x128xf32>
    %19 = vector.broadcast %17 : vector<1x128xf32> to vector<6x128xf32>
    %20 = arith.mulf %18, %19 : vector<6x128xf32>
    %21 = arith.addf %15, %20 : vector<6x128xf32>
    %c0_5 = arith.constant 0 : index
    %c0_6 = arith.constant 0 : index
    %22 = vector.load %arg4[%c0_5, %c0_6] : memref<6x128xf32, #tpu.memory_space<vmem>>, vector<6x128xf32>
    tpu.vector_store %arg4[%c0_5, %c0_6], %21 {strides = array<i32>} : memref<6x128xf32, #tpu.memory_space<vmem>>, vector<6x128xf32>,
    return
  }
  func.func @transform_0(%arg0: i32) -> (i32, i32) {
    %c0_i32 = arith.constant 0 : i32
    %c0_i32_0 = arith.constant 0 : i32
    return %c0_i32, %arg0 : i32, i32
  }
  func.func @transform_1(%arg0: i32) -> (i32, i32) {
    %c0_i32 = arith.constant 0 : i32
    %c0_i32_0 = arith.constant 0 : i32
    %c0_i32_1 = arith.constant 0 : i32
    return %c0_i32, %c0_i32_0 : i32, i32
  }
  func.func @transform_2(%arg0: i32) -> (i32, i32) {
    %c0_i32 = arith.constant 0 : i32
    %c0_i32_0 = arith.constant 0 : i32
    %c0_i32_1 = arith.constant 0 : i32
    return %c0_i32, %c0_i32_0 : i32, i32
  }
  func.func @transform_3(%arg0: i32) -> (i32, i32) {
    %c0_i32 = arith.constant 0 : i32
    %c0_i32_0 = arith.constant 0 : i32
    return %c0_i32, %arg0 : i32, i32
  }
}

</mosaic_0001>

<bundles_post_ra>
// kernel: tpu_custom_call.1
= control target key start
LH: loop header
LB: loop body
LE: loop exit
PB: predicated region body
PF: predicated region fallthrough
CT: control target
= control target key end

     0   :  { %8 = vsyncpa [#allocation3], 0  ;;  %s514_s0 = inlined_call_operand.vmem [shape: f32[3,512], index: 0, kind: input, shape index: {}]   ;;  %s515_s1 = inlined_call_operand.vmem [shape: f32[6,3], index: 1, kind: input, shape index: {}]   ;;  %s516_s2 = inlined_call_operand.vmem [shape: f32[6,1], index: 2, kind: input, shape index: {}]   ;;  %s517_s3 = inlined_call_operand.hbm [shape: f32[6,512], index: 3, kind: output, shape index: {}]  }
   0x1   :  { %10 = vsyncpa [#allocation3 + $0x1], 0  ;;  %s421_s12 = smov 0   ;;  %s423_s13 = smov 0  }
   0x2   :  { %s425_s14 = smov 0   ;;  %s427_s15 = smov 0  }
   0x3 LB: > { %s442_s16 = sadd.s32 4294967295, %s395_s15   ;;  %s279_s17 = sadd.s32 4294967294, %s395_s15   ;;  %s395_s15 = sphi %s427_s15, %s523_s15   ;;  %s391_s14 = sphi %s425_s14, %s522_s14   ;;  %s387_s13 = sphi %s423_s13, %s521_s13   ;;  %s383_s12 = sphi %s421_s12, %s520_s12  }
   0x4   : > { %s446_s18 = sadd.s32 1, %s395_s15   ;;  %s91_s19 = sadd.s32 1, %s391_s14 }
   0x5   : > { %s88_s20 = ssub.s32 %s395_s15, %s446_s18  ;;  %p101_p0 = scmp.ne.s32.totalorder %s391_s14, %s387_s13 }
   0x6   : > { %p89_p1 = scmp.eq.s32.totalorder %s88_s20, 0  ;;  %p102_p2 = scmp.eq.s32.totalorder %s442_s16, 3 }
   0x7   : > { %p107_p3 = scmp.ne.s32.totalorder %s387_s13, %s383_s12  ;;  %p108_p4 = scmp.eq.s32.totalorder %s279_s17, 3 }
   0x8   : > { %s457_s21 = scalar_select %p89_p1, %s391_s14, %s91_s19  }
   0x9   : > { %p459_p5 = por %p102_p2, %p101_p0  ;;  %p463_p6 = por %p108_p4, %p107_p3 }
   0xa   : > { %p282_p7 = scmp.ge.s32.totalorder %s395_s15, 1  ;;  %p139_p8 = scmp.lt.s32.totalorder %s395_s15, 5 }
   0xc   : > { %p140_p9 = pnand %p282_p7, %p139_p8 }
   0xd   : > { %p162_p10 = scmp.lt.s32.totalorder (!%p140_p9), %s442_s16, 3  ;;  %s159_s6 = sand.u32 (!%p140_p9), 1, %s387_s13  }
   0xe   : > { %143 = sbr.rel (%p140_p9) target bundleno = 168 (0xa8), region = 32  ;;  %s283_s7 = sshll.u32 (!%p140_p9), %s159_s6, 3 }
   0xf   : > { %s286_s8 = sshll.u32 (!%p140_p9), %s442_s16, 7  ;;  %s161_s9 = scalar_lea.vmem (!%p140_p9), [#allocation2], %s283_s7 }
  0x10   : > { %s220_s10 = sshll.u32 (!%p140_p9), %s161_s9, 4  ;;  %s218_s19 = scalar_lea.hbm (!%p140_p9), %s517_s3, %s286_s8  ;;  %s221_s10 = int_to_ptr.vmem [resolvable:$true] %s220_s10 }
  0x11   : > { %s207_s20 = scalar_lea.sflag (!%p140_p9), [#allocation3], %s159_s6  ;;  %s335_s24 = scalar_lea.vmem (!%p140_p9), %s221_s10, 128 }
  0x12   : > { %p336_p11 = scmp.ne.s32.totalorder (!%p140_p9), %s221_s10, %s335_s24  ;;  %s400_s25 = smov (!%p140_p9), [#allocation2]  }
  0x13   : > { %v167_v0 = vld [vmem:[%s515_s1] sm:$0x3f]  ;;  %v397_v1 = vmov 0   ;;  %v398_v2 = vmov 1   ;;  %v399_v4 = vmov 2   ;;  %s163_s28 = scalar_select %p162_p10, %s442_s16, 3  ;;  %v174_v5 = vlaneseq }
  0x14   : > { %331 = vset.pattern.permute.xlu0 %v397_v1  ;;  %332 = vset.pattern.permute.xlu1 %v398_v2  ;;  %v168_v3 = vld [vmem:[%s516_s2] sm:$0x3f]  ;;  %p337_p12 = pnand %p336_p11, %p459_p5  ;;  %s339_s26 = sshll.u32 %s400_s25, 4  ;;  %s340_s26 = int_to_ptr.vmem [resolvable:$false] %s339_s26 }
  0x15   : > { %171 = vperm.xlu0 %331, %v167_v0   ;;  %186 = vperm.xlu1 %332, %v167_v0   ;;  %s284_s29 = sshll.u32 %s163_s28, 2  ;;  %v175_v6 = vshrl.u32 %v174_v5, 7  ;;  %s341_s16 = scalar_lea.vmem %s340_s26, 256 }
  0x16   : > { %s165_s5 = scalar_lea.vmem %s514_s0, %s284_s29  ;;  %p338_p13 = pneg %p337_p12 }
  0x17   : > { %v176_v7 = vsub.s32 0, %v175_v6  ;;  %v166_v8 = vld [vmem:[%s165_s5] sm:$0x7]  ;;  %v191_v9 = vsub.s32 1, %v175_v6  ;;  %v201_v10 = vsub.s32 2, %v175_v6  ;;  %p342_p0 = scmp.lt.s32.totalorder %s221_s10, %s340_s26  ;;  %p343_p1 = scmp.lt.s32.totalorder %s341_s16, %s335_s24 }
  0x19   : > { %181 = vperm.xlu0 %331, %v168_v3   ;;  %333 = vset.pattern.permute.xlu1 %v399_v4  ;;  %v177_v11 = vrot.slane %v166_v8, %v176_v7  ;;  %v192_v14 = vrot.slane %v166_v8, %v191_v9  ;;  %v202_v15 = vrot.slane %v166_v8, %v201_v10  ;;  %p344_p2 = por %p343_p1, %p342_p0 }
  0x1a   : > { %196 = vperm.xlu1 %333, %v167_v0  }
  0x1b   : > { %p345_p3 = pnand %p344_p2, %p338_p13 }
  0x1d   : > { %334 = vset.pattern.permute.xlu0 %v399_v4 }
  0x90   : > { %v172_v12 = vpop.permute.xlu0 %171  ;;  %v187_v13 = vpop.permute.xlu1 %186 }
  0x91   : > { %v178_v16 = vmul.f32 %v177_v11, %v172_v12  ;;  %v193_v18 = vmul.f32 %v192_v14, %v187_v13 }
  0x94   : > { %v182_v17 = vpop.permute.xlu0 %181 }
  0x95   : > { %v184_v19 = vadd.f32 %v182_v17, %v178_v16  ;;  %v197_v20 = vpop.permute.xlu1 %196 }
  0x96   : > { %v203_v21 = vmul.f32 %v202_v15, %v197_v20 }
  0x97   : > { %v194_v22 = vadd.f32 %v193_v18, %v184_v19 }
  0x99   : > { %v204_v23 = vadd.f32 %v203_v21, %v194_v22 }
  0x9b   : > { %205 = vst [vmem:[%s161_s9] sm:$0x3f] %v204_v23 }
  0x9c   : > { %348 = shalt.err (!%p345_p3)
}
  0x9d   : > { %s349_s27 = scalar_lea.hbm %s218_s19, 128  ;;  %s353_s30 = scalar_lea.hbm %s517_s3, 512 }
  0x9e   : > { %p350_p4 = scmp.ne.s32.totalorder %s218_s19, %s349_s27  ;;  %p354_p9 = scmp.lt.s32.totalorder %s218_s19, %s517_s3 }
  0x9f   : > { %p355_p10 = scmp.lt.s32.totalorder %s353_s30, %s349_s27 }
  0xa0   : > { %p351_p7 = pnand %p350_p4, %p459_p5 }
  0xa1   : > { %p356_p11 = por %p355_p10, %p354_p9 }
  0xa2   : > { %p352_p8 = pneg %p351_p7 }
  0xa4   : > { %p357_p12 = pnand %p356_p11, %p352_p8 }
  0xa6   : > { %360 = shalt.err (!%p357_p12)
}
  0xa7   : > { %289 = dma.vmem_to_hbm [thread:$0]  (%p459_p5), %s221_s10, 128, %s218_s19, %s207_s20  }
  0xa8 PF: > { %p295_p13 = scmp.ge.s32.totalorder %s395_s15, 2  ;;  %s232_s6 = sand.u32 1, %s383_s12  }
  0xa9   : > { %s233_s7 = scalar_lea.sflag [#allocation3], %s232_s6 }
  0xaa   : > { %p292_p0 = pnand %p295_p13, %p463_p6 }
  0xac   : > { %p293_p1 = pneg %p292_p0 }
  0xae   : > { %378 = dma.done.wait (%p293_p1), %s233_s7, 128  }
  0xaf   : > { %380 = vsyncadd (%p293_p1), %s233_s7, 4294967168  ;;  %p13_p2 = scmp.ge.s32.totalorder %s446_s18, 6   ;;  %s520_s12 = smov %s387_s13 }
  0xb0   : > { %s521_s13 = smov %s391_s14  ;;  %s522_s14 = smov %s457_s21 }
  0xb1   : > { %s523_s15 = smov %s446_s18  ;;  %15 = sbr.rel (!%p13_p2) target bundleno = 3 (0x3), region = 67 }
  0xb6   :  { %238 = vsyncpa [#allocation3], 1 }
  0xb7   :  { %240 = vsyncpa [#allocation3 + $0x1], 1 }

</bundles_post_ra>
